<compile_context>
chip_gen: v7x
topology: tpu7x:2x2x1
jax: 0.10.0
libtpu: 0.0.40
codegen_flags: <defaults>
</compile_context>

<pallas_src>
import functools
import math

import jax
import jax.numpy as jnp
from jax import lax
from jax.experimental import pallas as pl
from jax.experimental.pallas import tpu as pltpu


def _mha_fused_kernel(xq_ref, xk_ref, xv_ref,
                      wqkv_ref, bqkv_ref, wo_ref, bo_ref,
                      out_ref, attn_ref, *, scale, n_heads, d_head):
    """Fused per-batch QKV projection + attention + output projection.

    Block shapes for grid point b:
      xq_ref  : (1, Lq, D)      query activations of batch b
      xk_ref  : (1, Lk, D)      key activations
      xv_ref  : (1, Lk, D)      value activations
      wqkv_ref: (3, D, D)       stacked [Wq; Wk; Wv], PyTorch [out, in] layout
      bqkv_ref: (3, 1, D)       stacked [bq; bk; bv]
      wo_ref  : (D, D)          output projection weight (PyTorch [out, in])
      bo_ref  : (1, D)          output projection bias
      out_ref : (1, Lq, D)      final projected output (lane-dense store)
      attn_ref: (1, H, Lq, Lk)  softmax attention weights
    """
    # x @ W^T expressed directly as a contraction (no materialized transpose).
    contract = (((1,), (1,)), ((), ()))

    xq = xq_ref[0]                      # [Lq, D]
    xk = xk_ref[0]                      # [Lk, D]
    xv = xv_ref[0]                      # [Lk, D]

    # Full-width projections (one MXU push each, N = d_model).
    q = lax.dot_general(xq, wqkv_ref[0], contract,
                        preferred_element_type=jnp.float32) + bqkv_ref[0]   # [Lq, D]
    k = lax.dot_general(xk, wqkv_ref[1], contract,
                        preferred_element_type=jnp.float32) + bqkv_ref[1]   # [Lk, D]
    v = lax.dot_general(xv, wqkv_ref[2], contract,
                        preferred_element_type=jnp.float32) + bqkv_ref[2]   # [Lk, D]

    # Per-head attention; H is small and static, so a fully unrolled loop of
    # plain 2-D MXU dots (static lane slices of q/k/v are free).
    attn_blocks = []
    ctx_blocks = []
    for h in range(n_heads):
        sl = slice(h * d_head, (h + 1) * d_head)
        qh, kh, vh = q[:, sl], k[:, sl], v[:, sl]                           # [L, Dh]

        s = lax.dot_general(qh, kh, contract,
                            preferred_element_type=jnp.float32) * scale     # [Lq, Lk]
        m = jnp.max(s, axis=-1, keepdims=True)
        p = jnp.exp(s - m)
        denom = jnp.sum(p, axis=-1, keepdims=True)
        a = p * pl.reciprocal(denom, approx=False)                           # [Lq, Lk]

        attn_blocks.append(a)
        ctx_blocks.append(jnp.dot(a, vh, preferred_element_type=jnp.float32))  # [Lq, Dh]

    # Single store of the full per-batch attention block.
    attn_ref[0] = jnp.stack(attn_blocks, axis=0).astype(attn_ref.dtype)     # [H, Lq, Lk]

    # Concat heads in VMEM (lane-dim concat) and fuse the output projection.
    ctx = jnp.concatenate(ctx_blocks, axis=-1)                               # [Lq, D]
    out = lax.dot_general(ctx, wo_ref[...], contract,
                          preferred_element_type=jnp.float32) + bo_ref[...]  # [Lq, D]
    out_ref[0] = out.astype(out_ref.dtype)


@functools.partial(jax.jit, static_argnames=("n_heads",))
def multi_head_attention_forward(query, key, value, params, n_heads):
    """query/key/value: [B, L, d_model] f32. Returns (out [B, Lq, d_model], attn [B, H, Lq, Lk])."""
    B, Lq, D = query.shape
    _, Lk, _ = key.shape
    H = n_heads
    Dh = D // H
    assert D == H * Dh, "d_model must be divisible by n_heads"

    scale = 1.0 / math.sqrt(Dh)

    # Stack projection params so the kernel gets one resident weight / bias load.
    wqkv = jnp.stack([params["wq"], params["wk"], params["wv"]], axis=0)          # (3, D, D)
    bqkv = jnp.stack([params["bq"].reshape(1, D),
                      params["bk"].reshape(1, D),
                      params["bv"].reshape(1, D)], axis=0)                        # (3, 1, D)
    wo = params["wo"]                                                             # (D, D)
    bo = params["bo"].reshape(1, D)                                               # (1, D)

    kernel = functools.partial(_mha_fused_kernel, scale=scale, n_heads=H, d_head=Dh)

    out, attn = pl.pallas_call(
        kernel,
        out_shape=(
            jax.ShapeDtypeStruct((B, Lq, D), query.dtype),
            jax.ShapeDtypeStruct((B, H, Lq, Lk), jnp.float32),
        ),
        grid=(B,),
        in_specs=[
            pl.BlockSpec((1, Lq, D), lambda b: (b, 0, 0)),
            pl.BlockSpec((1, Lk, D), lambda b: (b, 0, 0)),
            pl.BlockSpec((1, Lk, D), lambda b: (b, 0, 0)),
            # Grid-invariant index_maps: weights/biases are DMA'd once and stay resident.
            pl.BlockSpec((3, D, D), lambda b: (0, 0, 0)),
            pl.BlockSpec((3, 1, D), lambda b: (0, 0, 0)),
            pl.BlockSpec((D, D), lambda b: (0, 0)),
            pl.BlockSpec((1, D), lambda b: (0, 0)),
        ],
        out_specs=(
            pl.BlockSpec((1, Lq, D), lambda b: (b, 0, 0)),
            pl.BlockSpec((1, H, Lq, Lk), lambda b: (b, 0, 0, 0)),
        ),
        compiler_params=pltpu.CompilerParams(
            dimension_semantics=("parallel",)),   # B >= 2 -> both TCs on v7x
    )(query, key, value, wqkv, bqkv, wo, bo)

    return out, attn


if __name__ == "__main__":
    key = jax.random.PRNGKey(0)
    ks = jax.random.split(key, 11)

    B, S, d_model, n_heads = 2, 8, 32, 4
    d_head = d_model // n_heads

    def init_linear(kw, kb, fan_out, fan_in):
        bound = 1.0 / math.sqrt(fan_in)
        w = jax.random.uniform(kw, (fan_out, fan_in), jnp.float32, -bound, bound)
        b = jax.random.uniform(kb, (fan_out,), jnp.float32, -bound, bound)
        return w, b

    wq, bq = init_linear(ks[0], ks[1], d_model, d_model)
    wk, bk = init_linear(ks[2], ks[3], d_model, d_model)
    wv, bv = init_linear(ks[4], ks[5], d_model, d_model)
    wo, bo = init_linear(ks[6], ks[7], d_model, d_model)
    params = dict(wq=wq, bq=bq, wk=wk, bk=bk, wv=wv, bv=bv, wo=wo, bo=bo)

    q_in = jax.random.normal(ks[8], (B, S, d_model), jnp.float32)
    k_in = jax.random.normal(ks[9], (B, S, d_model), jnp.float32)
    v_in = jax.random.normal(ks[10], (B, S, d_model), jnp.float32)

    out, attn = multi_head_attention_forward(q_in, k_in, v_in, params, n_heads=n_heads)
    out = jax.block_until_ready(out)
    attn = jax.block_until_ready(attn)

    # Pure-JAX reference (eval mode => no dropout; pe_type='absolute_sin' => no rel-pos terms).
    def reference(q_x, k_x, v_x, p):
        hp = "highest"
        def proj(x, w, b):
            y = jnp.einsum("bld,od->blo", x, w, precision=hp) + b
            return y.reshape(B, S, n_heads, d_head).transpose(0, 2, 1, 3)
        q = proj(q_x, p["wq"], p["bq"])
        k = proj(k_x, p["wk"], p["bk"])
        v = proj(v_x, p["wv"], p["bv"])
        scores = jnp.einsum("bhqd,bhkd->bhqk", q, k, precision=hp) / math.sqrt(d_head)
        a = jax.nn.softmax(scores, axis=-1)
        c = jnp.einsum("bhqk,bhkd->bhqd", a, v, precision=hp)
        c = c.transpose(0, 2, 1, 3).reshape(B, S, d_model)
        o = jnp.einsum("bld,od->blo", c, p["wo"], precision=hp) + p["bo"]
        return o, a

    ref_out, ref_attn = reference(q_in, k_in, v_in, params)

    assert out.shape == (B, S, d_model)
    assert attn.shape == (B, n_heads, S, S)
    assert jnp.allclose(attn, ref_attn, atol=2e-3, rtol=2e-3), \
        float(jnp.max(jnp.abs(attn - ref_attn)))
    assert jnp.allclose(out, ref_out, atol=2e-3, rtol=2e-3), \
        float(jnp.max(jnp.abs(out - ref_out)))

    print("KERNEL_OK")
</pallas_src>

<mosaic_0001>
module attributes {stable_mosaic.version = 11 : i64} {
  func.func @_mha_fused_kernel(%arg0: i32, %arg1: memref<1x8x32xf32, #tpu.memory_space<vmem>>, %arg2: memref<1x8x32xf32, #tpu.memory_space<vmem>>, %arg3: memref<1x8x32xf32, #tpu.memory_space<vmem>>, %arg4: memref<3x32x32xf32, #tpu.memory_space<vmem>>, %arg5: memref<3x1x32xf32, #tpu.memory_space<vmem>>, %arg6: memref<32x32xf32, #tpu.memory_space<vmem>>, %arg7: memref<1x32xf32, #tpu.memory_space<vmem>>, %arg8: memref<1x8x32xf32, #tpu.memory_space<vmem>>, %arg9: memref<1x4x8x8xf32, #tpu.memory_space<vmem>>) attributes {dimension_semantics = [#tpu.dimension_semantics<parallel>], iteration_bounds = array<i64: 2>, scalar_prefetch = 0 : i64, scratch_operands = 0 : i64, tpu.core_type = #tpu.core_type<tc>, window_params = [{transform_indices = @transform_0, window_bounds = array<i64: 1, 8, 32>}, {transform_indices = @transform_1, window_bounds = array<i64: 1, 8, 32>}, {transform_indices = @transform_2, window_bounds = array<i64: 1, 8, 32>}, {pipeline_mode = #tpu.pipeline_mode<synchronous>, transform_indices = @transform_3, window_bounds = array<i64: 3, 32, 32>}, {pipeline_mode = #tpu.pipeline_mode<synchronous>, transform_indices = @transform_4, window_bounds = array<i64: 3, 1, 32>}, {pipeline_mode = #tpu.pipeline_mode<synchronous>, transform_indices = @transform_5, window_bounds = array<i64: 32, 32>}, {pipeline_mode = #tpu.pipeline_mode<synchronous>, transform_indices = @transform_6, window_bounds = array<i64: 1, 32>}, {transform_indices = @transform_7, window_bounds = array<i64: 1, 8, 32>}, {transform_indices = @transform_8, window_bounds = array<i64: 1, 4, 8, 8>}]} {
    %c0 = arith.constant 0 : index
    %c0_0 = arith.constant 0 : index
    %c0_1 = arith.constant 0 : index
    %0 = vector.load %arg1[%c0, %c0_0, %c0_1] : memref<1x8x32xf32, #tpu.memory_space<vmem>>, vector<1x8x32xf32>
    %1 = vector.shape_cast %0 : vector<1x8x32xf32> to vector<8x32xf32>
    %c0_2 = arith.constant 0 : index
    %c0_3 = arith.constant 0 : index
    %c0_4 = arith.constant 0 : index
    %2 = vector.load %arg2[%c0_2, %c0_3, %c0_4] : memref<1x8x32xf32, #tpu.memory_space<vmem>>, vector<1x8x32xf32>
    %3 = vector.shape_cast %2 : vector<1x8x32xf32> to vector<8x32xf32>
    %c0_5 = arith.constant 0 : index
    %c0_6 = arith.constant 0 : index
    %c0_7 = arith.constant 0 : index
    %4 = vector.load %arg3[%c0_5, %c0_6, %c0_7] : memref<1x8x32xf32, #tpu.memory_space<vmem>>, vector<1x8x32xf32>
    %5 = vector.shape_cast %4 : vector<1x8x32xf32> to vector<8x32xf32>
    %c0_8 = arith.constant 0 : index
    %c0_9 = arith.constant 0 : index
    %c0_10 = arith.constant 0 : index
    %6 = vector.load %arg4[%c0_8, %c0_9, %c0_10] : memref<3x32x32xf32, #tpu.memory_space<vmem>>, vector<1x32x32xf32>
    %7 = vector.shape_cast %6 : vector<1x32x32xf32> to vector<32x32xf32>
    %cst = arith.constant dense<0.000000e+00> : vector<8x32xf32>
    %8 = tpu.matmul %1, %7, %cst {dimension_numbers = #tpu.dot_dimension_numbers<[1], [1], [0], [0], [0, 0, 1, 0], [], []>} : vector<8x32xf32>, vector<32x32xf32>, vector<8x32xf32> -> vector<8x32xf32>
    %c0_11 = arith.constant 0 : index
    %c0_12 = arith.constant 0 : index
    %c0_13 = arith.constant 0 : index
    %9 = vector.load %arg5[%c0_11, %c0_12, %c0_13] : memref<3x1x32xf32, #tpu.memory_space<vmem>>, vector<1x1x32xf32>
    %10 = vector.shape_cast %9 : vector<1x1x32xf32> to vector<1x32xf32>
    %11 = vector.broadcast %10 : vector<1x32xf32> to vector<8x32xf32>
    %12 = arith.addf %8, %11 : vector<8x32xf32>
    %c1 = arith.constant 1 : index
    %c0_14 = arith.constant 0 : index
    %c0_15 = arith.constant 0 : index
    %13 = vector.load %arg4[%c1, %c0_14, %c0_15] : memref<3x32x32xf32, #tpu.memory_space<vmem>>, vector<1x32x32xf32>
    %14 = vector.shape_cast %13 : vector<1x32x32xf32> to vector<32x32xf32>
    %cst_16 = arith.constant dense<0.000000e+00> : vector<8x32xf32>
    %15 = tpu.matmul %3, %14, %cst_16 {dimension_numbers = #tpu.dot_dimension_numbers<[1], [1], [0], [0], [0, 0, 1, 0], [], []>} : vector<8x32xf32>, vector<32x32xf32>, vector<8x32xf32> -> vector<8x32xf32>
    %c1_17 = arith.constant 1 : index
    %c0_18 = arith.constant 0 : index
    %c0_19 = arith.constant 0 : index
    %16 = vector.load %arg5[%c1_17, %c0_18, %c0_19] : memref<3x1x32xf32, #tpu.memory_space<vmem>>, vector<1x1x32xf32>
    %17 = vector.shape_cast %16 : vector<1x1x32xf32> to vector<1x32xf32>
    %18 = vector.broadcast %17 : vector<1x32xf32> to vector<8x32xf32>
    %19 = arith.addf %15, %18 : vector<8x32xf32>
    %c2 = arith.constant 2 : index
    %c0_20 = arith.constant 0 : index
    %c0_21 = arith.constant 0 : index
    %20 = vector.load %arg4[%c2, %c0_20, %c0_21] : memref<3x32x32xf32, #tpu.memory_space<vmem>>, vector<1x32x32xf32>
    %21 = vector.shape_cast %20 : vector<1x32x32xf32> to vector<32x32xf32>
    %cst_22 = arith.constant dense<0.000000e+00> : vector<8x32xf32>
    %22 = tpu.matmul %5, %21, %cst_22 {dimension_numbers = #tpu.dot_dimension_numbers<[1], [1], [0], [0], [0, 0, 1, 0], [], []>} : vector<8x32xf32>, vector<32x32xf32>, vector<8x32xf32> -> vector<8x32xf32>
    %c2_23 = arith.constant 2 : index
    %c0_24 = arith.constant 0 : index
    %c0_25 = arith.constant 0 : index
    %23 = vector.load %arg5[%c2_23, %c0_24, %c0_25] : memref<3x1x32xf32, #tpu.memory_space<vmem>>, vector<1x1x32xf32>
    %24 = vector.shape_cast %23 : vector<1x1x32xf32> to vector<1x32xf32>
    %25 = vector.broadcast %24 : vector<1x32xf32> to vector<8x32xf32>
    %26 = arith.addf %22, %25 : vector<8x32xf32>
    %27 = vector.extract_strided_slice %12 {offsets = [0, 0], sizes = [8, 8], strides = [1, 1]} : vector<8x32xf32> to vector<8x8xf32>
    %28 = vector.extract_strided_slice %19 {offsets = [0, 0], sizes = [8, 8], strides = [1, 1]} : vector<8x32xf32> to vector<8x8xf32>
    %29 = vector.extract_strided_slice %26 {offsets = [0, 0], sizes = [8, 8], strides = [1, 1]} : vector<8x32xf32> to vector<8x8xf32>
    %cst_26 = arith.constant dense<0.000000e+00> : vector<8x8xf32>
    %30 = tpu.matmul %27, %28, %cst_26 {dimension_numbers = #tpu.dot_dimension_numbers<[1], [1], [0], [0], [0, 0, 1, 0], [], []>} : vector<8x8xf32>, vector<8x8xf32>, vector<8x8xf32> -> vector<8x8xf32>
    %cst_27 = arith.constant 0.353553385 : f32
    %31 = vector.broadcast %cst_27 : f32 to vector<8x8xf32>
    %32 = arith.mulf %30, %31 : vector<8x8xf32>
    %cst_28 = arith.constant dense<0xFF800000> : vector<8xf32>
    %33 = vector.multi_reduction <maximumf>, %32, %cst_28 [1] : vector<8x8xf32> to vector<8xf32>
    %34 = vector.shape_cast %33 : vector<8xf32> to vector<8x1xf32>
    %35 = vector.broadcast %34 : vector<8x1xf32> to vector<8x8xf32>
    %36 = arith.subf %32, %35 : vector<8x8xf32>
    %37 = math.exp %36 : vector<8x8xf32>
    %cst_29 = arith.constant dense<0.000000e+00> : vector<8xf32>
    %38 = vector.multi_reduction <add>, %37, %cst_29 [1] : vector<8x8xf32> to vector<8xf32>
    %39 = vector.shape_cast %38 : vector<8xf32> to vector<8x1xf32>
    %40 = tpu.reciprocal %39 : vector<8x1xf32> -> vector<8x1xf32>
    %41 = vector.broadcast %40 : vector<8x1xf32> to vector<8x8xf32>
    %42 = arith.mulf %37, %41 : vector<8x8xf32>
    %cst_30 = arith.constant dense<0.000000e+00> : vector<8x8xf32>
    %43 = tpu.matmul %42, %29, %cst_30 {dimension_numbers = #tpu.dot_dimension_numbers<[1], [0], [0], [1], [0, 0, 1, 1], [], []>} : vector<8x8xf32>, vector<8x8xf32>, vector<8x8xf32> -> vector<8x8xf32>
    %44 = vector.extract_strided_slice %12 {offsets = [0, 8], sizes = [8, 8], strides = [1, 1]} : vector<8x32xf32> to vector<8x8xf32>
    %45 = vector.extract_strided_slice %19 {offsets = [0, 8], sizes = [8, 8], strides = [1, 1]} : vector<8x32xf32> to vector<8x8xf32>
    %46 = vector.extract_strided_slice %26 {offsets = [0, 8], sizes = [8, 8], strides = [1, 1]} : vector<8x32xf32> to vector<8x8xf32>
    %cst_31 = arith.constant dense<0.000000e+00> : vector<8x8xf32>
    %47 = tpu.matmul %44, %45, %cst_31 {dimension_numbers = #tpu.dot_dimension_numbers<[1], [1], [0], [0], [0, 0, 1, 0], [], []>} : vector<8x8xf32>, vector<8x8xf32>, vector<8x8xf32> -> vector<8x8xf32>
    %cst_32 = arith.constant 0.353553385 : f32
    %48 = vector.broadcast %cst_32 : f32 to vector<8x8xf32>
    %49 = arith.mulf %47, %48 : vector<8x8xf32>
    %cst_33 = arith.constant dense<0xFF800000> : vector<8xf32>
    %50 = vector.multi_reduction <maximumf>, %49, %cst_33 [1] : vector<8x8xf32> to vector<8xf32>
    %51 = vector.shape_cast %50 : vector<8xf32> to vector<8x1xf32>
    %52 = vector.broadcast %51 : vector<8x1xf32> to vector<8x8xf32>
    %53 = arith.subf %49, %52 : vector<8x8xf32>
    %54 = math.exp %53 : vector<8x8xf32>
    %cst_34 = arith.constant dense<0.000000e+00> : vector<8xf32>
    %55 = vector.multi_reduction <add>, %54, %cst_34 [1] : vector<8x8xf32> to vector<8xf32>
    %56 = vector.shape_cast %55 : vector<8xf32> to vector<8x1xf32>
    %57 = tpu.reciprocal %56 : vector<8x1xf32> -> vector<8x1xf32>
    %58 = vector.broadcast %57 : vector<8x1xf32> to vector<8x8xf32>
    %59 = arith.mulf %54, %58 : vector<8x8xf32>
    %cst_35 = arith.constant dense<0.000000e+00> : vector<8x8xf32>
    %60 = tpu.matmul %59, %46, %cst_35 {dimension_numbers = #tpu.dot_dimension_numbers<[1], [0], [0], [1], [0, 0, 1, 1], [], []>} : vector<8x8xf32>, vector<8x8xf32>, vector<8x8xf32> -> vector<8x8xf32>
    %61 = vector.extract_strided_slice %12 {offsets = [0, 16], sizes = [8, 8], strides = [1, 1]} : vector<8x32xf32> to vector<8x8xf32>
    %62 = vector.extract_strided_slice %19 {offsets = [0, 16], sizes = [8, 8], strides = [1, 1]} : vector<8x32xf32> to vector<8x8xf32>
    %63 = vector.extract_strided_slice %26 {offsets = [0, 16], sizes = [8, 8], strides = [1, 1]} : vector<8x32xf32> to vector<8x8xf32>
    %cst_36 = arith.constant dense<0.000000e+00> : vector<8x8xf32>
    %64 = tpu.matmul %61, %62, %cst_36 {dimension_numbers = #tpu.dot_dimension_numbers<[1], [1], [0], [0], [0, 0, 1, 0], [], []>} : vector<8x8xf32>, vector<8x8xf32>, vector<8x8xf32> -> vector<8x8xf32>
    %cst_37 = arith.constant 0.353553385 : f32
    %65 = vector.broadcast %cst_37 : f32 to vector<8x8xf32>
    %66 = arith.mulf %64, %65 : vector<8x8xf32>
    %cst_38 = arith.constant dense<0xFF800000> : vector<8xf32>
    %67 = vector.multi_reduction <maximumf>, %66, %cst_38 [1] : vector<8x8xf32> to vector<8xf32>
    %68 = vector.shape_cast %67 : vector<8xf32> to vector<8x1xf32>
    %69 = vector.broadcast %68 : vector<8x1xf32> to vector<8x8xf32>
    %70 = arith.subf %66, %69 : vector<8x8xf32>
    %71 = math.exp %70 : vector<8x8xf32>
    %cst_39 = arith.constant dense<0.000000e+00> : vector<8xf32>
    %72 = vector.multi_reduction <add>, %71, %cst_39 [1] : vector<8x8xf32> to vector<8xf32>
    %73 = vector.shape_cast %72 : vector<8xf32> to vector<8x1xf32>
    %74 = tpu.reciprocal %73 : vector<8x1xf32> -> vector<8x1xf32>
    %75 = vector.broadcast %74 : vector<8x1xf32> to vector<8x8xf32>
    %76 = arith.mulf %71, %75 : vector<8x8xf32>
    %cst_40 = arith.constant dense<0.000000e+00> : vector<8x8xf32>
    %77 = tpu.matmul %76, %63, %cst_40 {dimension_numbers = #tpu.dot_dimension_numbers<[1], [0], [0], [1], [0, 0, 1, 1], [], []>} : vector<8x8xf32>, vector<8x8xf32>, vector<8x8xf32> -> vector<8x8xf32>
    %78 = vector.extract_strided_slice %12 {offsets = [0, 24], sizes = [8, 8], strides = [1, 1]} : vector<8x32xf32> to vector<8x8xf32>
    %79 = vector.extract_strided_slice %19 {offsets = [0, 24], sizes = [8, 8], strides = [1, 1]} : vector<8x32xf32> to vector<8x8xf32>
    %80 = vector.extract_strided_slice %26 {offsets = [0, 24], sizes = [8, 8], strides = [1, 1]} : vector<8x32xf32> to vector<8x8xf32>
    %cst_41 = arith.constant dense<0.000000e+00> : vector<8x8xf32>
    %81 = tpu.matmul %78, %79, %cst_41 {dimension_numbers = #tpu.dot_dimension_numbers<[1], [1], [0], [0], [0, 0, 1, 0], [], []>} : vector<8x8xf32>, vector<8x8xf32>, vector<8x8xf32> -> vector<8x8xf32>
    %cst_42 = arith.constant 0.353553385 : f32
    %82 = vector.broadcast %cst_42 : f32 to vector<8x8xf32>
    %83 = arith.mulf %81, %82 : vector<8x8xf32>
    %cst_43 = arith.constant dense<0xFF800000> : vector<8xf32>
    %84 = vector.multi_reduction <maximumf>, %83, %cst_43 [1] : vector<8x8xf32> to vector<8xf32>
    %85 = vector.shape_cast %84 : vector<8xf32> to vector<8x1xf32>
    %86 = vector.broadcast %85 : vector<8x1xf32> to vector<8x8xf32>
    %87 = arith.subf %83, %86 : vector<8x8xf32>
    %88 = math.exp %87 : vector<8x8xf32>
    %cst_44 = arith.constant dense<0.000000e+00> : vector<8xf32>
    %89 = vector.multi_reduction <add>, %88, %cst_44 [1] : vector<8x8xf32> to vector<8xf32>
    %90 = vector.shape_cast %89 : vector<8xf32> to vector<8x1xf32>
    %91 = tpu.reciprocal %90 : vector<8x1xf32> -> vector<8x1xf32>
    %92 = vector.broadcast %91 : vector<8x1xf32> to vector<8x8xf32>
    %93 = arith.mulf %88, %92 : vector<8x8xf32>
    %cst_45 = arith.constant dense<0.000000e+00> : vector<8x8xf32>
    %94 = tpu.matmul %93, %80, %cst_45 {dimension_numbers = #tpu.dot_dimension_numbers<[1], [0], [0], [1], [0, 0, 1, 1], [], []>} : vector<8x8xf32>, vector<8x8xf32>, vector<8x8xf32> -> vector<8x8xf32>
    %95 = vector.shape_cast %42 : vector<8x8xf32> to vector<1x8x8xf32>
    %96 = vector.shape_cast %59 : vector<8x8xf32> to vector<1x8x8xf32>
    %97 = vector.shape_cast %76 : vector<8x8xf32> to vector<1x8x8xf32>
    %98 = vector.shape_cast %93 : vector<8x8xf32> to vector<1x8x8xf32>
    %99 = tpu.concatenate %95, %96, %97, %98 in 0 : vector<1x8x8xf32>, vector<1x8x8xf32>, vector<1x8x8xf32>, vector<1x8x8xf32> -> vector<4x8x8xf32>
    %c0_46 = arith.constant 0 : index
    %c0_47 = arith.constant 0 : index
    %c0_48 = arith.constant 0 : index
    %c0_49 = arith.constant 0 : index
    %100 = vector.load %arg9[%c0_46, %c0_47, %c0_48, %c0_49] : memref<1x4x8x8xf32, #tpu.memory_space<vmem>>, vector<1x4x8x8xf32>
    %101 = vector.shape_cast %100 : vector<1x4x8x8xf32> to vector<4x8x8xf32>
    %102 = vector.shape_cast %99 : vector<4x8x8xf32> to vector<1x4x8x8xf32>
    tpu.vector_store %arg9[%c0_46, %c0_47, %c0_48, %c0_49], %102 {strides = array<i32>} : memref<1x4x8x8xf32, #tpu.memory_space<vmem>>, vector<1x4x8x8xf32>,
    %103 = tpu.concatenate %43, %60, %77, %94 in 1 : vector<8x8xf32>, vector<8x8xf32>, vector<8x8xf32>, vector<8x8xf32> -> vector<8x32xf32>
    %c0_50 = arith.constant 0 : index
    %c0_51 = arith.constant 0 : index
    %104 = vector.load %arg6[%c0_50, %c0_51] : memref<32x32xf32, #tpu.memory_space<vmem>>, vector<32x32xf32>
    %cst_52 = arith.constant dense<0.000000e+00> : vector<8x32xf32>
    %105 = tpu.matmul %103, %104, %cst_52 {dimension_numbers = #tpu.dot_dimension_numbers<[1], [1], [0], [0], [0, 0, 1, 0], [], []>} : vector<8x32xf32>, vector<32x32xf32>, vector<8x32xf32> -> vector<8x32xf32>
    %c0_53 = arith.constant 0 : index
    %c0_54 = arith.constant 0 : index
    %106 = vector.load %arg7[%c0_53, %c0_54] : memref<1x32xf32, #tpu.memory_space<vmem>>, vector<1x32xf32>
    %107 = vector.broadcast %106 : vector<1x32xf32> to vector<8x32xf32>
    %108 = arith.addf %105, %107 : vector<8x32xf32>
    %c0_55 = arith.constant 0 : index
    %c0_56 = arith.constant 0 : index
    %c0_57 = arith.constant 0 : index
    %109 = vector.load %arg8[%c0_55, %c0_56, %c0_57] : memref<1x8x32xf32, #tpu.memory_space<vmem>>, vector<1x8x32xf32>
    %110 = vector.shape_cast %109 : vector<1x8x32xf32> to vector<8x32xf32>
    %111 = vector.shape_cast %108 : vector<8x32xf32> to vector<1x8x32xf32>
    tpu.vector_store %arg8[%c0_55, %c0_56, %c0_57], %111 {strides = array<i32>} : memref<1x8x32xf32, #tpu.memory_space<vmem>>, vector<1x8x32xf32>,
    return
  }
  func.func @transform_0(%arg0: i32) -> (i32, i32, i32) {
    %c0_i32 = arith.constant 0 : i32
    %c0_i32_0 = arith.constant 0 : i32
    %c0_i32_1 = arith.constant 0 : i32
    return %arg0, %c0_i32, %c0_i32_0 : i32, i32, i32
  }
  func.func @transform_1(%arg0: i32) -> (i32, i32, i32) {
    %c0_i32 = arith.constant 0 : i32
    %c0_i32_0 = arith.constant 0 : i32
    %c0_i32_1 = arith.constant 0 : i32
    return %arg0, %c0_i32, %c0_i32_0 : i32, i32, i32
  }
  func.func @transform_2(%arg0: i32) -> (i32, i32, i32) {
    %c0_i32 = arith.constant 0 : i32
    %c0_i32_0 = arith.constant 0 : i32
    %c0_i32_1 = arith.constant 0 : i32
    return %arg0, %c0_i32, %c0_i32_0 : i32, i32, i32
  }
  func.func @transform_3(%arg0: i32) -> (i32, i32, i32) {
    %c0_i32 = arith.constant 0 : i32
    %c0_i32_0 = arith.constant 0 : i32
    %c0_i32_1 = arith.constant 0 : i32
    %c0_i32_2 = arith.constant 0 : i32
    return %c0_i32, %c0_i32_0, %c0_i32_1 : i32, i32, i32
  }
  func.func @transform_4(%arg0: i32) -> (i32, i32, i32) {
    %c0_i32 = arith.constant 0 : i32
    %c0_i32_0 = arith.constant 0 : i32
    %c0_i32_1 = arith.constant 0 : i32
    %c0_i32_2 = arith.constant 0 : i32
    return %c0_i32, %c0_i32_0, %c0_i32_1 : i32, i32, i32
  }
  func.func @transform_5(%arg0: i32) -> (i32, i32) {
    %c0_i32 = arith.constant 0 : i32
    %c0_i32_0 = arith.constant 0 : i32
    %c0_i32_1 = arith.constant 0 : i32
    return %c0_i32, %c0_i32_0 : i32, i32
  }
  func.func @transform_6(%arg0: i32) -> (i32, i32) {
    %c0_i32 = arith.constant 0 : i32
    %c0_i32_0 = arith.constant 0 : i32
    %c0_i32_1 = arith.constant 0 : i32
    return %c0_i32, %c0_i32_0 : i32, i32
  }
  func.func @transform_7(%arg0: i32) -> (i32, i32, i32) {
    %c0_i32 = arith.constant 0 : i32
    %c0_i32_0 = arith.constant 0 : i32
    %c0_i32_1 = arith.constant 0 : i32
    return %arg0, %c0_i32, %c0_i32_0 : i32, i32, i32
  }
  func.func @transform_8(%arg0: i32) -> (i32, i32, i32, i32) {
    %c0_i32 = arith.constant 0 : i32
    %c0_i32_0 = arith.constant 0 : i32
    %c0_i32_1 = arith.constant 0 : i32
    %c0_i32_2 = arith.constant 0 : i32
    return %arg0, %c0_i32, %c0_i32_0, %c0_i32_1 : i32, i32, i32, i32
  }
}

</mosaic_0001>

<bundles_post_ra>
// kernel: multi_head_attention_forward.1
= control target key start
LH: loop header
LB: loop body
LE: loop exit
PB: predicated region body
PF: predicated region fallthrough
CT: control target
= control target key end

     0   :  { %s2347_s0 = inlined_call_operand.vmem [shape: f32[2,8,32], index: 0, kind: input, shape index: {}]   ;;  %s2348_s1 = inlined_call_operand.vmem [shape: f32[2,8,32], index: 1, kind: input, shape index: {}]   ;;  %s2349_s2 = inlined_call_operand.vmem [shape: f32[2,8,32], index: 2, kind: input, shape index: {}]   ;;  %s2350_s3 = inlined_call_operand.vmem [shape: f32[3,32,32], index: 3, kind: input, shape index: {}]   ;;  %s2351_s4 = inlined_call_operand.vmem [shape: f32[3,1,32], index: 4, kind: input, shape index: {}]   ;;  %s2352_s5 = inlined_call_operand.vmem [shape: f32[32,32], index: 5, kind: input, shape index: {}]   ;;  %s2353_s6 = inlined_call_operand.vmem [shape: f32[1,32], index: 6, kind: input, shape index: {}]   ;;  %s2354_s7 = inlined_call_operand.hbm [shape: f32[2,8,32], index: 7, kind: output, shape index: {0}]   ;;  %s2355_s8 = inlined_call_operand.hbm [shape: f32[2,4,8,8], index: 8, kind: output, shape index: {1}]  }
   0x1   :  { %2356 = sst [smem:[#allocation8_spill]] %s2347_s0 }
   0x2   :  { %2357 = sst [smem:[#allocation9_spill]] %s2348_s1 }
   0x3   :  { %14 = vsyncpa [#allocation3], 0 }
   0x4   :  { %16 = vsyncpa [#allocation3 + $0x1], 0 }
   0x5   :  { %17 = vsyncpa [#allocation5], 0 }
   0x6   :  { %19 = vsyncpa [#allocation5 + $0x1], 0  ;;  %s2009_s27 = smov 0   ;;  %s2011_s28 = smov 0  }
   0x7   :  { %s2013_s29 = smov 0   ;;  %s2015_s30 = smov 0  }
   0x8 LB: > { %s2030_s9 = sadd.s32 4294967295, %s1950_s30   ;;  %s1571_s10 = sadd.s32 4294967294, %s1950_s30   ;;  %s1950_s30 = sphi %s2015_s30, %s2367_s30   ;;  %s1946_s29 = sphi %s2013_s29, %s2366_s29   ;;  %s1942_s28 = sphi %s2011_s28, %s2365_s28   ;;  %s1938_s27 = sphi %s2009_s27, %s2364_s27  }
   0x9   : > { %s2034_s11 = sadd.s32 1, %s1950_s30   ;;  %s194_s12 = sadd.s32 1, %s1946_s29 }
   0xa   : > { %s191_s13 = ssub.s32 %s1950_s30, %s2034_s11  ;;  %p204_p0 = scmp.ne.s32.totalorder %s1946_s29, %s1942_s28 }
   0xb   : > { %p192_p1 = scmp.eq.s32.totalorder %s191_s13, 0  ;;  %p205_p2 = scmp.eq.s32.totalorder %s2030_s9, 1 }
   0xc   : > { %p210_p3 = scmp.ne.s32.totalorder %s1942_s28, %s1938_s27  ;;  %p211_p4 = scmp.eq.s32.totalorder %s1571_s10, 1 }
   0xd   : > { %s2045_s14 = scalar_select %p192_p1, %s1946_s29, %s194_s12  }
   0xe   : > { %p2047_p5 = por %p205_p2, %p204_p0  ;;  %p2051_p6 = por %p211_p4, %p210_p3 }
   0xf   : > { %p1574_p7 = scmp.ge.s32.totalorder %s1950_s30, 1  ;;  %p288_p8 = scmp.lt.s32.totalorder %s1950_s30, 3 }
  0x11   : > { %p289_p9 = pnand %p1574_p7, %p288_p8 }
  0x12   : > { %vm360_vm0 = vcmask (!%p289_p9), 261120   ;;  %v1586_v0 = vld [vmem:[%s2350_s3 + $0x20] sm:$0xff] (!%p289_p9)  ;;  %v1587_v1 = vld [vmem:[%s2350_s3 + $0x28] sm:$0xff] (!%p289_p9)  ;;  %v1952_v3 = vmov (!%p289_p9), 0.0|0.0   ;;  %p334_p10 = scmp.lt.s32.totalorder (!%p289_p9), %s2030_s9, 1  ;;  %vm1953_vm2 = vmmov (!%p289_p9), 0  }
  0x13   : > { %292 = sbr.rel (%p289_p9) target bundleno = 2933 (0xb75), region = 48  ;;  %v349_v2 = vld [vmem:[%s2350_s3] sm:$0xff] (!%p289_p9)  ;;  %1762 = vmatprep.subr.bf16.mxu1 (!%p289_p9), %v1952_v3  ;;  %vm2069_vm1 = vmpackc.low (!%p289_p9), %vm360_vm0, %vm360_vm0  ;;  %v1763_v5 = vpack.c.bf16 (!%p289_p9), %v1587_v1, %v1586_v0  ;;  %1754 = vmatprep.subr.bf16.mxu0 (!%p289_p9), %v1952_v3  ;;  %v350_v6 = vld [vmem:[%s2350_s3 + $0x8] sm:$0xff] (!%p289_p9)  ;;  %v1954_v8 = vmov (!%p289_p9), 0.0   ;;  %s2362_s1 = sld [smem:[#allocation9_spill]] (!%p289_p9)  ;;  %vm642_vm3 = vcmask (!%p289_p9), 64512  }
  0x14   : > { %v1755_v7 = vpack.c.bf16 (!%p289_p9), %v350_v6, %v349_v2  ;;  %1689 = vmatprep.mubr.msk.f32.mxu1 (!%p289_p9), %vm1953_vm2, %v1954_v8  ;;  %1678 = vmatprep.mubr.msk.f32.mxu0 (!%p289_p9), %vm1953_vm2, %v1954_v8  ;;  %v1588_v9 = vld [vmem:[%s2350_s3 + $0x30] sm:$0xff] (!%p289_p9)  ;;  %v1589_v10 = vld [vmem:[%s2350_s3 + $0x38] sm:$0xff] (!%p289_p9)  ;;  %s2363_s0 = sld [smem:[#allocation8_spill]] (!%p289_p9)  ;;  %v1591_v17 = vld [vmem:[%s2351_s4 + $0x1] ss:$0 sm:$0xff] (!%p289_p9)  ;;  %s1955_s19 = smov (!%p289_p9), 120  }
  0x15   : > { %1765 = vmatpush3.bf16.xpose.msk.msra.mxu1 (!%p289_p9), %vm2069_vm1, %v1763_v5  ;;  %v351_v11 = vld [vmem:[%s2350_s3 + $0x10] sm:$0xff] (!%p289_p9)  ;;  %v352_v12 = vld [vmem:[%s2350_s3 + $0x18] sm:$0xff] (!%p289_p9)  ;;  %v1767_v13 = vpack.c.bf16 (!%p289_p9), %v1589_v10, %v1588_v9  ;;  %v1580_v18 = vld [vmem:[%s2351_s4] ss:$0 sm:$0xff] (!%p289_p9)  ;;  %s2181_s22 = sand.u32 (!%p289_p9), 1, %s1942_s28   ;;  %s1956_s25 = smov (!%p289_p9), 112  }
  0x16   : > { %1757 = vmatpush3.bf16.xpose.msk.msra.mxu0 (!%p289_p9), %vm2069_vm1, %v1755_v7  ;;  %1766 = vmatprep.subr.bf16.mxu1 (!%p289_p9), %v1952_v3  ;;  %v1759_v14 = vpack.c.bf16 (!%p289_p9), %v352_v12, %v351_v11  ;;  %v1597_v25 = vld [vmem:[%s2350_s3 + $0x40] sm:$0xff] (!%p289_p9)  ;;  %v1598_v26 = vld [vmem:[%s2350_s3 + $0x48] sm:$0xff] (!%p289_p9)  ;;  %v1599_v28 = vld [vmem:[%s2350_s3 + $0x50] sm:$0xff] (!%p289_p9)  ;;  %s1576_s23 = sshll.u32 (!%p289_p9), %s2181_s22, 5  ;;  %s1958_s26 = smov (!%p289_p9), 8   ;;  %vm1320_vm4 = vcmask (!%p289_p9), 130048  }
  0x17   : > { %1758 = vmatprep.subr.bf16.mxu0 (!%p289_p9), %v1952_v3  ;;  %v1771_v27 = vpack.c.bf16 (!%p289_p9), %v1598_v26, %v1597_v25  ;;  %v1600_v29 = vld [vmem:[%s2350_s3 + $0x58] sm:$0xff] (!%p289_p9)  ;;  %v1602_v41 = vld [vmem:[%s2351_s4 + $0x2] ss:$0 sm:$0xff] (!%p289_p9)  ;;  %vm1322_vm5 = vcmask (!%p289_p9), 195584   ;;  %s1633_s12 = sshll.u32 (!%p289_p9), %s2030_s9, 9 }
  0x18   : > { %v1775_v30 = vpack.c.bf16 (!%p289_p9), %v1600_v29, %v1599_v28 }
  0x1a   : > { %s335_s20 = scalar_select %p334_p10, %s2030_s9, 1 }
  0x1c   : > { %s2103_s21 = sshll.u32 %s335_s20, 3 }
  0x1d   : > { %1769 = vmatpush3.bf16.xpose.msk.msra.mxu1 %vm2069_vm1, %v1767_v13  ;;  %s341_s24 = scalar_lea.vmem %s2362_s1, %s2103_s21  ;;  %s337_s10 = scalar_lea.vmem %s2363_s0, %s2103_s21 }
  0x1e   : > { %1761 = vmatpush3.bf16.xpose.msk.msra.mxu0 %vm2069_vm1, %v1759_v14  ;;  %1703 = vmatprep.subr.mxu1 %v1954_v8  ;;  %v347_v15 = vld [vmem:[%s341_s24] sm:$0xff]  ;;  %s345_s18 = scalar_lea.vmem %s2349_s2, %s2103_s21  ;;  %s2185_s24 = scalar_lea.vmem [#allocation4], %s1576_s23 }
  0x1f   : > { %1770 = vmatprep.subr.bf16.mxu0 %v1952_v3  ;;  %v346_v16 = vld [vmem:[%s337_s10] sm:$0xff]  ;;  %s1959_s10 = smov 16   ;;  %s1427_s21 = scalar_lea.sflag [#allocation5], %s2181_s22 }
  0x20   : > { %v348_v31 = vld [vmem:[%s345_s18] sm:$0xff]  ;;  %s2268_s18 = scalar_lea.hbm %s2355_s8, %s1633_s12  ;;  %s1961_s23 = smov [#allocation4]  }
  0x24   : > { %1690 = vmatmul.mubr.msk.f32.vlgmr.msra.gmra.mrb[0].mxu1 %vm360_vm0, %v347_v15 }
  0x25   : > { %1679 = vmatmul.mubr.msk.f32.vlgmr.msra.gmra.mrb[0].mxu0 %vm360_vm0, %v346_v16  ;;  %1705 = vmatprep.mubr.msk.f32.mxu1 %vm1953_vm2, %v1954_v8 }
  0x26   : > { %1700 = vmatprep.mubr.msk.f32.mxu0 %vm1953_vm2, %v1954_v8  ;;  %1773 = vmatpush3.bf16.xpose.msk.msra.mxu0 %vm2069_vm1, %v1771_v27 }
  0x27   : > { %1774 = vmatprep.subr.bf16.mxu0 %v1952_v3 }
  0x2e   : > { %1777 = vmatpush3.bf16.xpose.msk.msra.mxu0 %vm2069_vm1, %v1775_v30 }
  0x2f   : > { %1778 = vmatprep.subr.bf16.mxu0 %v1952_v3 }
  0x35   : > { %1701 = vmatmul.mubr.msk.f32.vlgmr.msra.gmra.mrb[2].mxu0 %vm360_vm0, %v348_v31 }
  0x36   : > { %1751 = vmatprep.mubr.msk.f32.mxu0 %vm1953_vm2, %v1954_v8 }
  0xf7   : > { %v540_v19 = vpop.f32.mrb[0].mxu1 }
  0xf8   : > { %v2131_v20 = vadd.f32 %v1591_v17, %v540_v19  ;;  %v1691_v21 = vpop.f32.mrb[1].mxu1  ;;  %v442_v22 = vpop.f32.mrb[0].mxu0 }
  0xf9   : > { %v2133_v23 = vadd.f32 %v1580_v18, %v442_v22  ;;  %v1680_v24 = vpop.f32.mrb[1].mxu0 }
  0xfa   : > { %806 = vrot.lane.b32.xlu1 %v2131_v20, %s1955_s19  ;;  %1704 = vmatpush3.xpose.msk.msra.mxu1 %vm642_vm3, %v2131_v20 }
  0xfb   : > { %1708 = vmatprep.subr.mxu1 %v1954_v8 }
  0xfd   : > { %1706 = vmatmul.mubr.msk.f32.vlgmr.msra.gmra.mrb[2].mxu1 %vm642_vm3, %v2133_v23 }
  0xfe   : > { %804 = vrot.lane.b32.xlu1 %v2133_v23, %s1955_s19  ;;  %1710 = vmatprep.mubr.msk.f32.mxu1 %vm1953_vm2, %v1954_v8 }
 0x108   : > { %v638_v42 = vpop.f32.mrb[2].mxu0 }
 0x109   : > { %v2176_v43 = vadd.f32 %v1602_v41, %v638_v42  ;;  %v1702_v44 = vpop.f32.mrb[3].mxu0  ;;  %v1327_v41 = vld [vmem:[%s2352_s5 + $0x18] sm:$0xff] }
 0x10b   : > { %1709 = vmatpush3.msra.mxu1 %v2176_v43 }
 0x10c   : > { %1713 = vmatprep.subr.mxu1 %v1954_v8 }
 0x16c   : > { %v807_v47 = vpop.permute.xlu1 %806 }
 0x170   : > { %v805_v49 = vpop.permute.xlu1 %804 }
 0x1d0   : > { %v715_v32 = vpop.f32.mrb[2].mxu1 }
 0x1d1   : > { %v719_v33 = vmul.f32 0.35355338, %v715_v32  ;;  %v1707_v34 = vpop.f32.mrb[3].mxu1 }
 0x1d3   : > { %v720_v35 = vsel %vm642_vm3, %v719_v33, -inf }
 0x1d4   : > { %721 = vmax.xlane.f32.xlu0 %v720_v35 }
 0x261   : > { %v722_v36 = vpop.xlane.xlu0 %721 }
 0x262   : > { %v723_v37 = vsub.f32 %v719_v33, %v722_v36 }
 0x264   : > { %v724_v38 = vmul.f32 1.442695, %v723_v37  ;;  %v1324_v37 = vld [vmem:[%s2352_s5] sm:$0xff] }
 0x266   : > { %1840 = vpow2.f32 %v724_v38  ;;  %v1325_v38 = vld [vmem:[%s2352_s5 + $0x8] sm:$0xff] }
 0x270   : > { %v1841_v39 = vpop.eup %1840 }
 0x271   : > { %v726_v40 = vsel %vm642_vm3, %v1841_v39, 0.0 }
 0x272   : > { %727 = vadd.xlane.f32.xlu0 %v726_v40  ;;  %v1326_v40 = vld [vmem:[%s2352_s5 + $0x10] sm:$0xff] }
 0x273   : > { %v1783_v42 = vpack.c.bf16 %v1327_v41, %v1326_v40 }
 0x2ff   : > { %v728_v45 = vpop.xlane.xlu0 %727 }
 0x300   : > { %1842 = vrcp.f32 %v728_v45 }
 0x30a   : > { %v1843_v46 = vpop.eup %1842 }
 0x30b   : > { %v730_v48 = vmul.f32 %v1843_v46, %v1841_v39  ;;  %v1779_v39 = vpack.c.bf16 %v1325_v38, %v1324_v37 }
 0x30d   : > { %1711 = vmatmul.mubr.msk.f32.vlgmr.msra.gmra.mrb[4].mxu1 %vm642_vm3, %v730_v48  ;;  %1303 = vst.msk [vmem:[%s2185_s24] sm:$0xff] %vm642_vm3, %v730_v48  ;;  %1781 = vmatpush3.bf16.xpose.msk.msra.mxu0 %vm2069_vm1, %v1779_v39 }
 0x30e   : > { %1714 = vmatpush3.xpose.msk.msra.mxu1 %vm642_vm3, %v807_v47  ;;  %1715 = vmatprep.mubr.msk.f32.mxu1 %vm1953_vm2, %v1954_v8 }
 0x30f   : > { %1718 = vmatprep.subr.mxu1 %v1954_v8  ;;  %1782 = vmatprep.subr.bf16.mxu0 %v1952_v3 }
 0x311   : > { %1716 = vmatmul.mubr.msk.f32.vlgmr.msra.gmra.mrb[6].mxu1 %vm642_vm3, %v805_v49 }
 0x312   : > { %1720 = vmatprep.mubr.msk.f32.mxu1 %vm1953_vm2, %v1954_v8 }
 0x315   : > { %1785 = vmatpush3.bf16.xpose.msk.msra.mxu0 %vm2069_vm1, %v1783_v42 }
 0x3e0   : > { %v2196_v50 = vpop.f32.mrb[4].mxu1 }
 0x3e1   : > { %v1712_v51 = vpop.f32.mrb[5].mxu1 }
 0x3e4   : > { %v878_v52 = vpop.f32.mrb[6].mxu1 }
 0x3e5   : > { %v882_v53 = vmul.f32 0.35355338, %v878_v52  ;;  %v1717_v54 = vpop.f32.mrb[7].mxu1 }
 0x3e7   : > { %v883_v55 = vsel %vm642_vm3, %v882_v53, -inf }
 0x3e8   : > { %884 = vmax.xlane.f32.xlu0 %v883_v55 }
 0x3fe   : > { %895 = vrot.lane.b32.xlu0 %v2176_v43, %s1955_s19  ;;  %s1957_s19 = smov 104  }
 0x402   : > { %973 = vrot.lane.b32.xlu0 %v2131_v20, %s1956_s25 }
 0x406   : > { %971 = vrot.lane.b32.xlu0 %v2133_v23, %s1956_s25 }
 0x475   : > { %v885_v56 = vpop.xlane.xlu0 %884 }
 0x476   : > { %v886_v57 = vsub.f32 %v882_v53, %v885_v56 }
 0x478   : > { %v887_v58 = vmul.f32 1.442695, %v886_v57 }
 0x479   : > { %v896_v59 = vpop.permute.xlu0 %895 }
 0x47a   : > { %1844 = vpow2.f32 %v887_v58  ;;  %1719 = vmatpush3.msra.mxu1 %v896_v59 }
 0x47b   : > { %1723 = vmatprep.subr.mxu1 %v1954_v8 }
 0x47d   : > { %v974_v0 = vpop.permute.xlu0 %973 }
 0x481   : > { %v972_v2 = vpop.permute.xlu0 %971 }
 0x484   : > { %v1845_v60 = vpop.eup %1844 }
 0x485   : > { %v889_v61 = vsel %vm642_vm3, %v1845_v60, 0.0 }
 0x486   : > { %890 = vadd.xlane.f32.xlu1 %v889_v61 }
 0x497   : > { %1061 = vrot.lane.b32.xlu1 %v2176_v43, %s1956_s25  ;;  %s1860_s25 = sshll.u32 %s1961_s23, 4  ;;  %s1861_s25 = int_to_ptr.vmem [resolvable:$false] %s1860_s25 }
 0x49b   : > { %1139 = vrot.lane.b32.xlu1 %v2131_v20, %s1957_s19 }
 0x513   : > { %v891_v62 = vpop.xlane.xlu1 %890 }
 0x514   : > { %1846 = vrcp.f32 %v891_v62 }
 0x517   : > { %v1062_v5 = vpop.permute.xlu1 %1061 }
 0x51b   : > { %v1140_v18 = vpop.permute.xlu1 %1139 }
 0x51e   : > { %v1847_v63 = vpop.eup %1846 }
 0x51f   : > { %v893_v1 = vmul.f32 %v1847_v63, %v1845_v60 }
 0x521   : > { %1721 = vmatmul.mubr.msk.f32.vlgmr.msra.gmra.mrb[8].mxu1 %vm642_vm3, %v893_v1  ;;  %1304 = vst.msk [vmem:[%s2185_s24 + $0x8] sm:$0xff] %vm642_vm3, %v893_v1 }
 0x522   : > { %1724 = vmatpush3.xpose.msk.msra.mxu1 %vm642_vm3, %v974_v0  ;;  %1725 = vmatprep.mubr.msk.f32.mxu1 %vm1953_vm2, %v1954_v8 }
 0x523   : > { %1728 = vmatprep.subr.mxu1 %v1954_v8 }
 0x525   : > { %1726 = vmatmul.mubr.msk.f32.vlgmr.msra.gmra.mrb[10].mxu1 %vm642_vm3, %v972_v2 }
 0x526   : > { %1729 = vmatpush3.msra.mxu1 %v1062_v5  ;;  %1730 = vmatprep.mubr.msk.f32.mxu1 %vm1953_vm2, %v1954_v8 }
 0x527   : > { %1733 = vmatprep.subr.mxu1 %v1954_v8 }
 0x5f4   : > { %v967_v6 = vpop.f32.mrb[8].mxu1 }
 0x5f5   : > { %v1722_v7 = vpop.f32.mrb[9].mxu1 }
 0x5f8   : > { %v1045_v9 = vpop.f32.mrb[10].mxu1 }
 0x5f9   : > { %v1049_v10 = vmul.f32 0.35355338, %v1045_v9  ;;  %v1727_v11 = vpop.f32.mrb[11].mxu1 }
 0x5fb   : > { %v1050_v12 = vsel %vm642_vm3, %v1049_v10, -inf }
 0x5fc   : > { %1051 = vmax.xlane.f32.xlu0 %v1050_v12 }
 0x689   : > { %v1052_v13 = vpop.xlane.xlu0 %1051 }
 0x68a   : > { %v1053_v14 = vsub.f32 %v1049_v10, %v1052_v13 }
 0x68c   : > { %v1054_v15 = vmul.f32 1.442695, %v1053_v14 }
 0x68e   : > { %1848 = vpow2.f32 %v1054_v15 }
 0x698   : > { %v1849_v16 = vpop.eup %1848 }
 0x699   : > { %v1056_v17 = vsel %vm642_vm3, %v1849_v16, 0.0 }
 0x69a   : > { %1057 = vadd.xlane.f32.xlu1 %v1056_v17 }
 0x6ab   : > { %1137 = vrot.lane.b32.xlu1 %v2133_v23, %s1957_s19 }
 0x727   : > { %v1058_v19 = vpop.xlane.xlu1 %1057 }
 0x728   : > { %1850 = vrcp.f32 %v1058_v19 }
 0x72b   : > { %v1138_v22 = vpop.permute.xlu1 %1137 }
 0x732   : > { %v1851_v20 = vpop.eup %1850 }
 0x733   : > { %v1060_v21 = vmul.f32 %v1851_v20, %v1849_v16 }
 0x735   : > { %1731 = vmatmul.mubr.msk.f32.vlgmr.msra.gmra.mrb[12].mxu1 %vm642_vm3, %v1060_v21  ;;  %1305 = vst.msk [vmem:[%s2185_s24 + $0x10] sm:$0xff] %vm642_vm3, %v1060_v21 }
 0x736   : > { %1734 = vmatpush3.xpose.msk.msra.mxu1 %vm642_vm3, %v1140_v18  ;;  %1735 = vmatprep.mubr.msk.f32.mxu1 %vm1953_vm2, %v1954_v8 }
 0x737   : > { %1738 = vmatprep.subr.mxu1 %v1954_v8 }
 0x739   : > { %1736 = vmatmul.mubr.msk.f32.vlgmr.msra.gmra.mrb[14].mxu1 %vm642_vm3, %v1138_v22 }
 0x73a   : > { %1740 = vmatprep.mubr.msk.f32.mxu1 %vm1953_vm2, %v1954_v8 }
 0x808   : > { %v1133_v23 = vpop.f32.mrb[12].mxu1 }
 0x809   : > { %v1732_v24 = vpop.f32.mrb[13].mxu1 }
 0x80c   : > { %v1211_v25 = vpop.f32.mrb[14].mxu1 }
 0x80d   : > { %v1215_v26 = vmul.f32 0.35355338, %v1211_v25  ;;  %v1737_v27 = vpop.f32.mrb[15].mxu1 }
 0x80f   : > { %v1216_v28 = vsel %vm642_vm3, %v1215_v26, -inf }
 0x810   : > { %1217 = vmax.xlane.f32.xlu0 %v1216_v28 }
 0x826   : > { %1227 = vrot.lane.b32.xlu0 %v2176_v43, %s1957_s19  ;;  %s1960_s19 = smov 24  }
 0x82a   : > { %1308 = vrot.lane.b32.xlu0 %v967_v6, %s1958_s26 }
 0x82e   : > { %1312 = vrot.lane.b32.xlu0 %v1133_v23, %s1959_s10  ;;  %s1453_s10 = sshll.u32 %s2185_s24, 4  ;;  %s2263_s10 = int_to_ptr.vmem [resolvable:$true] %s1453_s10 }
 0x82f   : > { %s1856_s20 = scalar_lea.vmem %s2263_s10, 512  ;;  %p1863_p0 = scmp.lt.s32.totalorder %s2263_s10, %s1861_s25 }
 0x830   : > { %p1857_p11 = scmp.ne.s32.totalorder %s2263_s10, %s1856_s20 }
 0x832   : > { %p1858_p12 = pnand %p1857_p11, %p2047_p5 }
 0x834   : > { %p1859_p13 = pneg %p1858_p12 }
 0x89d   : > { %v1218_v29 = vpop.xlane.xlu0 %1217 }
 0x89e   : > { %v1219_v30 = vsub.f32 %v1215_v26, %v1218_v29 }
 0x8a0   : > { %v1220_v8 = vmul.f32 1.442695, %v1219_v30 }
 0x8a1   : > { %v1228_v31 = vpop.permute.xlu0 %1227 }
 0x8a2   : > { %1852 = vpow2.f32 %v1220_v8  ;;  %1739 = vmatpush3.msra.mxu1 %v1228_v31 }
 0x8a5   : > { %v1309_v3 = vpop.permute.xlu0 %1308 }
 0x8a6   : > { %v1319_v46 = vsel %vm642_vm3, %v2196_v50, %v1309_v3 }
 0x8a9   : > { %v1313_v45 = vpop.permute.xlu0 %1312 }
 0x8aa   : > { %v1321_v47 = vsel %vm1320_vm4, %v1319_v46, %v1313_v45 }
 0x8ac   : > { %v1853_v32 = vpop.eup %1852 }
 0x8ad   : > { %v1222_v33 = vsel %vm642_vm3, %v1853_v32, 0.0 }
 0x8ae   : > { %1223 = vadd.xlane.f32.xlu1 %v1222_v33 }
 0x93b   : > { %v1224_v34 = vpop.xlane.xlu1 %1223 }
 0x93c   : > { %1854 = vrcp.f32 %v1224_v34 }
 0x946   : > { %v1855_v35 = vpop.eup %1854 }
 0x947   : > { %v1226_v36 = vmul.f32 %v1855_v35, %v1853_v32 }
 0x949   : > { %1741 = vmatmul.mubr.msk.f32.vlgmr.msra.gmra.mrb[16].mxu1 %vm642_vm3, %v1226_v36  ;;  %1306 = vst.msk [vmem:[%s2185_s24 + $0x18] sm:$0xff] %vm642_vm3, %v1226_v36  ;;  %s1862_s24 = scalar_lea.vmem %s1861_s25, 1024 }
 0x94a   : > { %p1864_p1 = scmp.lt.s32.totalorder %s1862_s24, %s1856_s20 }
 0x94c   : > { %p1865_p2 = por %p1864_p1, %p1863_p0 }
 0x94e   : > { %p1866_p3 = pnand %p1865_p2, %p1859_p13 }
 0xa1c   : > { %v1299_v43 = vpop.f32.mrb[16].mxu1 }
 0xa1d   : > { %1316 = vrot.lane.b32.xlu0 %v1299_v43, %s1960_s19  ;;  %v1742_v44 = vpop.f32.mrb[17].mxu1 }
 0xa8f   : > { %v1317_v48 = vpop.permute.xlu0 %1316 }
 0xa90   : > { %v1323_v49 = vsel %vm1322_vm5, %v1321_v47, %v1317_v48 }
 0xa91   : > { %1752 = vmatmul.mubr.msk.f32.vlgmr.msra.gmra.mrb[4].mxu0 %vm360_vm0, %v1323_v49 }
 0xa92   : > { %1869 = shalt.err (!%p1866_p3)
}
 0xa93   : > { %s1870_s19 = scalar_lea.hbm %s2268_s18, 512  ;;  %s1874_s17 = scalar_lea.hbm %s2355_s8, 1024 }
 0xa94   : > { %p1871_p4 = scmp.ne.s32.totalorder %s2268_s18, %s1870_s19  ;;  %p1875_p9 = scmp.lt.u32.totalorder %s2268_s18, %s2355_s8 }
 0xa95   : > { %p1876_p10 = scmp.lt.u32.totalorder %s1874_s17, %s1870_s19  ;;  %p1878_p12 = scmp.lt.u32.totalorder %s1870_s19, %s2268_s18 }
 0xa96   : > { %p1872_p7 = pnand %p1871_p4, %p2047_p5 }
 0xa97   : > { %p1877_p11 = por %p1876_p10, %p1875_p9 }
 0xa98   : > { %p1873_p8 = pneg %p1872_p7 }
 0xa99   : > { %p1879_p13 = por %p1878_p12, %p1877_p11 }
 0xa9b   : > { %p1880_p0 = pnand %p1879_p13, %p1873_p8 }
 0xa9d   : > { %1883 = shalt.err (!%p1880_p0)
}
 0xa9e   : > { %s1962_s20 = smov 128   ;;  %s1575_s24 = sshll.u32 %s2181_s22, 3  ;;  %v1620_v4 = vld [vmem:[%s2353_s6] ss:$0 sm:$0xff] }
 0xa9f   : > { %1787 = dma.vmem_to_hbm [thread:$0]  (%p2047_p5), %s2263_s10, 512, %s2268_s18, %s1427_s21, %s1962_s20, %s1962_s20, %s1958_s26  }
 0xaa0   : > { %s1628_s19 = sshll.u32 %s2030_s9, 7  ;;  %s326_s17 = scalar_lea.vmem [#allocation2], %s1575_s24 }
 0xaa1   : > { %s1440_s23 = sshll.u32 %s326_s17, 4  ;;  %s2303_s1 = scalar_lea.hbm %s2354_s7, %s1628_s19  ;;  %s2305_s23 = int_to_ptr.vmem [resolvable:$true] %s1440_s23 }
 0xaa2   : > { %s1422_s26 = scalar_lea.sflag [#allocation3], %s2181_s22  ;;  %s1884_s10 = scalar_lea.vmem %s2305_s23, 128 }
 0xaa3   : > { %p1885_p1 = scmp.ne.s32.totalorder %s2305_s23, %s1884_s10  ;;  %s1963_s9 = smov [#allocation2]  }
 0xaa4   : > { %s1888_s18 = sshll.u32 %s1963_s9, 4  ;;  %s1889_s18 = int_to_ptr.vmem [resolvable:$false] %s1888_s18 }
 0xaa5   : > { %p1886_p2 = pnand %p1885_p1, %p2047_p5  ;;  %s1890_s21 = scalar_lea.vmem %s1889_s18, 256 }
 0xaa6   : > { %p1891_p4 = scmp.lt.s32.totalorder %s2305_s23, %s1889_s18  ;;  %p1892_p7 = scmp.lt.s32.totalorder %s1890_s21, %s1884_s10 }
 0xaa7   : > { %p1887_p3 = pneg %p1886_p2 }
 0xaa8   : > { %p1893_p8 = por %p1892_p7, %p1891_p4 }
 0xaaa   : > { %p1894_p9 = pnand %p1893_p8, %p1887_p3 }
 0xb64   : > { %v1416_v50 = vpop.f32.mrb[4].mxu0 }
 0xb65   : > { %v1417_v51 = vadd.f32 %v1620_v4, %v1416_v50  ;;  %v1753_v52 = vpop.f32.mrb[5].mxu0 }
 0xb67   : > { %1420 = vst.msk [vmem:[%s326_s17] sm:$0xff] %vm360_vm0, %v1417_v51 }
 0xb68   : > { %1897 = shalt.err (!%p1894_p9)
}
 0xb69   : > { %s1898_s0 = scalar_lea.hbm %s2303_s1, 128  ;;  %s1902_s24 = scalar_lea.hbm %s2354_s7, 256 }
 0xb6a   : > { %p1899_p10 = scmp.ne.s32.totalorder %s2303_s1, %s1898_s0  ;;  %p1903_p13 = scmp.lt.u32.totalorder %s2303_s1, %s2354_s7 }
 0xb6b   : > { %p1904_p0 = scmp.lt.u32.totalorder %s1902_s24, %s1898_s0  ;;  %p1906_p2 = scmp.lt.u32.totalorder %s1898_s0, %s2303_s1 }
 0xb6c   : > { %p1900_p11 = pnand %p1899_p10, %p2047_p5 }
 0xb6d   : > { %p1905_p1 = por %p1904_p0, %p1903_p13 }
 0xb6e   : > { %p1901_p12 = pneg %p1900_p11 }
 0xb6f   : > { %p1907_p3 = por %p1906_p2, %p1905_p1 }
 0xb71   : > { %p1908_p4 = pnand %p1907_p3, %p1901_p12 }
 0xb73   : > { %1911 = shalt.err (!%p1908_p4)
}
 0xb74   : > { %1786 = dma.vmem_to_hbm [thread:$0]  (%p2047_p5), %s2305_s23, 128, %s2303_s1, %s1422_s26  }
 0xb75 PF: > { %p1797_p7 = scmp.ge.s32.totalorder %s1950_s30, 2  ;;  %s1468_s19 = sand.u32 1, %s1938_s27  }
 0xb76   : > { %s1469_s17 = scalar_lea.sflag [#allocation3], %s1468_s19 }
 0xb77   : > { %p1791_p8 = pnand %p1797_p7, %p2051_p6 }
 0xb79   : > { %1929 = dma.done.wait (!%p1791_p8), %s1469_s17, 128  }
 0xb7a   : > { %1931 = vsyncadd (!%p1791_p8), %s1469_s17, 4294967168  ;;  %s1478_s25 = scalar_lea.sflag [#allocation5], %s1468_s19 }
 0xb7b   : > { %1933 = dma.done.wait (!%p1791_p8), %s1478_s25, 512  }
 0xb7c   : > { %1935 = vsyncadd (!%p1791_p8), %s1478_s25, 4294966784  ;;  %p22_p5 = scmp.ge.s32.totalorder %s2034_s11, 4   ;;  %s2364_s27 = smov %s1942_s28 }
 0xb7d   : > { %s2365_s28 = smov %s1946_s29  ;;  %s2366_s29 = smov %s2045_s14 }
 0xb7e   : > { %s2367_s30 = smov %s2034_s11  ;;  %24 = sbr.rel (!%p22_p5) target bundleno = 8 (0x8), region = 110 }
 0xb85   :  { %1483 = vsyncpa [#allocation3], 1 }
 0xb86   :  { %1485 = vsyncpa [#allocation3 + $0x1], 1 }
 0xb87   :  { %1486 = vsyncpa [#allocation5], 1 }
 0xb88   :  { %1488 = vsyncpa [#allocation5 + $0x1], 1 }

</bundles_post_ra>
